<compile_context>
chip_gen: v7x
topology: tpu7x:2x2x1
jax: 0.10.0
libtpu: 0.0.40
codegen_flags: <defaults>
</compile_context>

<pallas_src>
import functools

import jax
import jax.numpy as jnp
from jax import lax
from jax.experimental import pallas as pl
from jax.experimental.pallas import tpu as pltpu


def _mlp_kernel(x_ref, w1_ref, b1_ref, w2_ref, b2_ref, w3_ref, b3_ref, o_ref):
    # Layer 1: Linear(input_size -> hidden[0]) + ReLU   (bf16 MXU, f32 accumulate)
    h1 = jnp.dot(x_ref[...], w1_ref[...], preferred_element_type=jnp.float32)
    h1 = jnp.maximum(h1 + b1_ref[...], 0.0)
    # TODO(synk): training-mode dropout (stochastic masking) not applied; eval-mode forward only.

    # Layer 2: Linear(hidden[0] -> hidden[1]) + ReLU
    h2 = jnp.dot(h1.astype(jnp.bfloat16), w2_ref[...], preferred_element_type=jnp.float32)
    h2 = jnp.maximum(h2 + b2_ref[...], 0.0)                      # (TILE_B, H1) f32

    # Output layer: (1, H1) contracted with (TILE_B, H1) -> (1, TILE_B) lane-dense result.
    z = lax.dot_general(
        w3_ref[...], h2,
        dimension_numbers=(((1,), (1,)), ((), ())),
        preferred_element_type=jnp.float32,
    )                                                            # (1, TILE_B)
    z = z + b3_ref[0, 0]                                         # scalar bias from SMEM

    # Sigmoid: exp on EUP, approximate reciprocal on EUP (keeps VALU slots free).
    e = jnp.exp(-z)
    o_ref[...] = pl.reciprocal(1.0 + e, approx=True).astype(o_ref.dtype)


def _round_up(n, m):
    return -(-n // m) * m


@functools.partial(jax.jit, static_argnames=("tile_b",))
def scenario_predictor_forward(x, params, tile_b=1024):
    """Fused 3-layer MLP forward pass (batch-gridded Pallas kernel).

    x: (B, input_size) float32
    params: dict with w1 (in, h0), b1 (1, h0), w2 (h0, h1), b2 (1, h1),
            w3 (out, h1) [torch layout], b3 (1, out)
    returns: (B, out) float32 probabilities in [0, 1]
    """
    B, in_size = x.shape
    h0 = params["w1"].shape[1]
    h1 = params["w2"].shape[1]
    out_size = params["w3"].shape[0]
    assert out_size == 1, "kernel is specialized to output_size == 1"
    # TODO(synk): generalize the lane-dense output path to output_size > 1.

    # Batch tile: multiple of 128 (lane-dense output), capped at the padded batch.
    tile_b = max(128, _round_up(int(tile_b), 128))
    tile_b = min(tile_b, _round_up(B, 128))
    num_tiles = pl.cdiv(B, tile_b)
    b_pad = num_tiles * tile_b

    # bf16 inputs for the MXU / HBM traffic; pad batch to a whole number of tiles.
    x_bf16 = x.astype(jnp.bfloat16)
    if b_pad != B:
        x_bf16 = jnp.pad(x_bf16, ((0, b_pad - B), (0, 0)))
    w1 = params["w1"].astype(jnp.bfloat16)
    w2 = params["w2"].astype(jnp.bfloat16)
    b1 = params["b1"].astype(jnp.float32)
    b2 = params["b2"].astype(jnp.float32)
    w3 = params["w3"].astype(jnp.float32)          # (1, h1), torch layout
    b3 = params["b3"].astype(jnp.float32)          # (1, 1) -> SMEM scalar

    out = pl.pallas_call(
        _mlp_kernel,
        out_shape=jax.ShapeDtypeStruct((1, b_pad), jnp.float32),
        grid_spec=pltpu.PrefetchScalarGridSpec(
            num_scalar_prefetch=0,
            grid=(num_tiles,),
            in_specs=[
                pl.BlockSpec((tile_b, in_size), lambda i: (i, 0)),   # x tile (pipelined)
                pl.BlockSpec((in_size, h0), lambda i: (0, 0)),        # w1 resident
                pl.BlockSpec((1, h0), lambda i: (0, 0)),              # b1 resident
                pl.BlockSpec((h0, h1), lambda i: (0, 0)),             # w2 resident
                pl.BlockSpec((1, h1), lambda i: (0, 0)),              # b2 resident
                pl.BlockSpec((1, h1), lambda i: (0, 0)),              # w3 resident
                pl.BlockSpec(memory_space=pltpu.MemorySpace.SMEM),    # b3 scalar
            ],
            out_specs=pl.BlockSpec((1, tile_b), lambda i: (0, i)),    # lane-dense output
        ),
        compiler_params=pltpu.CompilerParams(
            dimension_semantics=("parallel",),
        ),
    )(x_bf16, w1, b1, w2, b2, w3, b3)

    # (1, b_pad) lane-major -> (B, 1) column of probabilities.
    return out[0, :B].reshape(B, 1)


def init_params(key, input_size, hidden_layers=(128, 64), output_size=1):
    """Deterministic init mimicking torch.nn.Linear (uniform +- 1/sqrt(fan_in)).
    w1/w2 stored transposed (in, out); w3 stored in torch layout (out, in)."""
    sizes = [input_size] + list(hidden_layers) + [output_size]
    params = {}
    for i, name in enumerate(["1", "2", "3"]):
        fan_in, fan_out = sizes[i], sizes[i + 1]
        key, kw, kb = jax.random.split(key, 3)
        bound = 1.0 / jnp.sqrt(float(fan_in))
        w = jax.random.uniform(kw, (fan_in, fan_out), jnp.float32, -bound, bound)
        if name == "3":
            w = w.T                                   # (out, in) torch layout for the NT matmul
        params[f"w{name}"] = w
        params[f"b{name}"] = jax.random.uniform(
            kb, (1, fan_out), jnp.float32, -bound, bound)
    return params


def reference_forward(x, params):
    h1 = jnp.maximum(x @ params["w1"] + params["b1"], 0.0)
    h2 = jnp.maximum(h1 @ params["w2"] + params["b2"], 0.0)
    z = h2 @ params["w3"].T + params["b3"]
    return jax.nn.sigmoid(z)


if __name__ == "__main__":
    key = jax.random.PRNGKey(0)
    batch, input_size = 200, 32          # ragged batch -> exercises multi-tile + tail padding
    hidden_layers = (128, 64)
    output_size = 1

    key, kx = jax.random.split(key)
    x = jax.random.normal(kx, (batch, input_size), jnp.float32)
    params = init_params(key, input_size, hidden_layers, output_size)

    # Small tile here to force num_tiles > 1; production default is 1024.
    out = scenario_predictor_forward(x, params, tile_b=128)
    out = jax.block_until_ready(out)

    ref = reference_forward(x, params)
    assert out.shape == (batch, output_size), out.shape
    # bf16 MXU operands + approx reciprocal -> compare against the f32 reference loosely.
    assert jnp.allclose(out, ref, atol=2e-2, rtol=2e-2), (
        f"mismatch vs reference: max abs err {jnp.max(jnp.abs(out - ref))}")
    assert bool(jnp.all((out >= 0.0) & (out <= 1.0)))

    print("KERNEL_OK")
</pallas_src>

<mosaic_0001>
module attributes {stable_mosaic.version = 11 : i64} {
  func.func @_mlp_kernel(%arg0: i32, %arg1: memref<128x32xbf16, #tpu.memory_space<vmem>>, %arg2: memref<32x128xbf16, #tpu.memory_space<vmem>>, %arg3: memref<1x128xf32, #tpu.memory_space<vmem>>, %arg4: memref<128x64xbf16, #tpu.memory_space<vmem>>, %arg5: memref<1x64xf32, #tpu.memory_space<vmem>>, %arg6: memref<1x64xf32, #tpu.memory_space<vmem>>, %arg7: memref<1x1xf32, #tpu.memory_space<smem>>, %arg8: memref<1x128xf32, #tpu.memory_space<vmem>>) attributes {dimension_semantics = [#tpu.dimension_semantics<parallel>], iteration_bounds = array<i64: 2>, scalar_prefetch = 0 : i64, scratch_operands = 0 : i64, tpu.core_type = #tpu.core_type<tc>, window_params = [{transform_indices = @transform_0, window_bounds = array<i64: 128, 32>}, {pipeline_mode = #tpu.pipeline_mode<synchronous>, transform_indices = @transform_1, window_bounds = array<i64: 32, 128>}, {pipeline_mode = #tpu.pipeline_mode<synchronous>, transform_indices = @transform_2, window_bounds = array<i64: 1, 128>}, {pipeline_mode = #tpu.pipeline_mode<synchronous>, transform_indices = @transform_3, window_bounds = array<i64: 128, 64>}, {pipeline_mode = #tpu.pipeline_mode<synchronous>, transform_indices = @transform_4, window_bounds = array<i64: 1, 64>}, {pipeline_mode = #tpu.pipeline_mode<synchronous>, transform_indices = @transform_5, window_bounds = array<i64: 1, 64>}, {transform_indices = @transform_6, window_bounds = array<i64: 1, 1>}, {transform_indices = @transform_7, window_bounds = array<i64: 1, 128>}]} {
    %c0 = arith.constant 0 : index
    %c0_0 = arith.constant 0 : index
    %0 = vector.load %arg1[%c0, %c0_0] : memref<128x32xbf16, #tpu.memory_space<vmem>>, vector<128x32xbf16>
    %c0_1 = arith.constant 0 : index
    %c0_2 = arith.constant 0 : index
    %1 = vector.load %arg2[%c0_1, %c0_2] : memref<32x128xbf16, #tpu.memory_space<vmem>>, vector<32x128xbf16>
    %cst = arith.constant dense<0.000000e+00> : vector<128x128xf32>
    %2 = tpu.matmul %0, %1, %cst {dimension_numbers = #tpu.dot_dimension_numbers<[1], [0], [0], [1], [0, 0, 1, 1], [], []>} : vector<128x32xbf16>, vector<32x128xbf16>, vector<128x128xf32> -> vector<128x128xf32>
    %c0_3 = arith.constant 0 : index
    %c0_4 = arith.constant 0 : index
    %3 = vector.load %arg3[%c0_3, %c0_4] : memref<1x128xf32, #tpu.memory_space<vmem>>, vector<1x128xf32>
    %4 = vector.broadcast %3 : vector<1x128xf32> to vector<128x128xf32>
    %5 = arith.addf %2, %4 : vector<128x128xf32>
    %cst_5 = arith.constant 0.000000e+00 : f32
    %6 = vector.broadcast %cst_5 : f32 to vector<128x128xf32>
    %7 = arith.maximumf %5, %6 : vector<128x128xf32>
    %8 = arith.truncf %7 : vector<128x128xf32> to vector<128x128xbf16>
    %c0_6 = arith.constant 0 : index
    %c0_7 = arith.constant 0 : index
    %9 = vector.load %arg4[%c0_6, %c0_7] : memref<128x64xbf16, #tpu.memory_space<vmem>>, vector<128x64xbf16>
    %cst_8 = arith.constant dense<0.000000e+00> : vector<128x64xf32>
    %10 = tpu.matmul %8, %9, %cst_8 {dimension_numbers = #tpu.dot_dimension_numbers<[1], [0], [0], [1], [0, 0, 1, 1], [], []>} : vector<128x128xbf16>, vector<128x64xbf16>, vector<128x64xf32> -> vector<128x64xf32>
    %c0_9 = arith.constant 0 : index
    %c0_10 = arith.constant 0 : index
    %11 = vector.load %arg5[%c0_9, %c0_10] : memref<1x64xf32, #tpu.memory_space<vmem>>, vector<1x64xf32>
    %12 = vector.broadcast %11 : vector<1x64xf32> to vector<128x64xf32>
    %13 = arith.addf %10, %12 : vector<128x64xf32>
    %cst_11 = arith.constant 0.000000e+00 : f32
    %14 = vector.broadcast %cst_11 : f32 to vector<128x64xf32>
    %15 = arith.maximumf %13, %14 : vector<128x64xf32>
    %c0_12 = arith.constant 0 : index
    %c0_13 = arith.constant 0 : index
    %16 = vector.load %arg6[%c0_12, %c0_13] : memref<1x64xf32, #tpu.memory_space<vmem>>, vector<1x64xf32>
    %cst_14 = arith.constant dense<0.000000e+00> : vector<1x128xf32>
    %17 = tpu.matmul %16, %15, %cst_14 {dimension_numbers = #tpu.dot_dimension_numbers<[1], [1], [0], [0], [0, 0, 1, 0], [], []>} : vector<1x64xf32>, vector<128x64xf32>, vector<1x128xf32> -> vector<1x128xf32>
    %c0_15 = arith.constant 0 : index
    %c0_16 = arith.constant 0 : index
    %18 = memref.load %arg7[%c0_15, %c0_16] : memref<1x1xf32, #tpu.memory_space<smem>>
    %19 = vector.broadcast %18 : f32 to vector<1x128xf32>
    %20 = arith.addf %17, %19 : vector<1x128xf32>
    %cst_17 = arith.constant 0.000000e+00 : f32
    %21 = vector.broadcast %cst_17 : f32 to vector<1x128xf32>
    %22 = arith.subf %21, %20 : vector<1x128xf32>
    %23 = math.exp %22 : vector<1x128xf32>
    %cst_18 = arith.constant 1.000000e+00 : f32
    %24 = vector.broadcast %cst_18 : f32 to vector<1x128xf32>
    %25 = arith.addf %24, %23 : vector<1x128xf32>
    %26 = tpu.reciprocal %25 {approx = true} : vector<1x128xf32> -> vector<1x128xf32>
    %c0_19 = arith.constant 0 : index
    %c0_20 = arith.constant 0 : index
    %27 = vector.load %arg8[%c0_19, %c0_20] : memref<1x128xf32, #tpu.memory_space<vmem>>, vector<1x128xf32>
    tpu.vector_store %arg8[%c0_19, %c0_20], %26 {strides = array<i32>} : memref<1x128xf32, #tpu.memory_space<vmem>>, vector<1x128xf32>,
    return
  }
  func.func @transform_0(%arg0: i32) -> (i32, i32) {
    %c0_i32 = arith.constant 0 : i32
    %c0_i32_0 = arith.constant 0 : i32
    return %arg0, %c0_i32 : i32, i32
  }
  func.func @transform_1(%arg0: i32) -> (i32, i32) {
    %c0_i32 = arith.constant 0 : i32
    %c0_i32_0 = arith.constant 0 : i32
    %c0_i32_1 = arith.constant 0 : i32
    return %c0_i32, %c0_i32_0 : i32, i32
  }
  func.func @transform_2(%arg0: i32) -> (i32, i32) {
    %c0_i32 = arith.constant 0 : i32
    %c0_i32_0 = arith.constant 0 : i32
    %c0_i32_1 = arith.constant 0 : i32
    return %c0_i32, %c0_i32_0 : i32, i32
  }
  func.func @transform_3(%arg0: i32) -> (i32, i32) {
    %c0_i32 = arith.constant 0 : i32
    %c0_i32_0 = arith.constant 0 : i32
    %c0_i32_1 = arith.constant 0 : i32
    return %c0_i32, %c0_i32_0 : i32, i32
  }
  func.func @transform_4(%arg0: i32) -> (i32, i32) {
    %c0_i32 = arith.constant 0 : i32
    %c0_i32_0 = arith.constant 0 : i32
    %c0_i32_1 = arith.constant 0 : i32
    return %c0_i32, %c0_i32_0 : i32, i32
  }
  func.func @transform_5(%arg0: i32) -> (i32, i32) {
    %c0_i32 = arith.constant 0 : i32
    %c0_i32_0 = arith.constant 0 : i32
    %c0_i32_1 = arith.constant 0 : i32
    return %c0_i32, %c0_i32_0 : i32, i32
  }
  func.func @transform_6(%arg0: i32) -> (i32, i32) {
    %c0_i32 = arith.constant 0 : i32
    %c0_i32_0 = arith.constant 0 : i32
    %c0_i32_1 = arith.constant 0 : i32
    return %c0_i32, %c0_i32_0 : i32, i32
  }
  func.func @transform_7(%arg0: i32) -> (i32, i32) {
    %c0_i32 = arith.constant 0 : i32
    %c0_i32_0 = arith.constant 0 : i32
    return %c0_i32, %arg0 : i32, i32
  }
}

</mosaic_0001>

<bundles_post_ra>
// kernel: scenario_predictor_forward.1
= control target key start
LH: loop header
LB: loop body
LE: loop exit
PB: predicated region body
PF: predicated region fallthrough
CT: control target
= control target key end

     0   :  { %s1169_s26 = smov 0   ;;  %s1279_s0 = inlined_call_operand.vmem [shape: bf16[256,32], index: 0, kind: input, shape index: {}]   ;;  %s1280_s1 = inlined_call_operand.vmem [shape: bf16[32,128], index: 1, kind: input, shape index: {}]   ;;  %s1281_s2 = inlined_call_operand.vmem [shape: f32[1,128], index: 2, kind: input, shape index: {}]   ;;  %s1282_s3 = inlined_call_operand.vmem [shape: bf16[128,64], index: 3, kind: input, shape index: {}]   ;;  %s1283_s4 = inlined_call_operand.vmem [shape: f32[1,64], index: 4, kind: input, shape index: {}]   ;;  %s1284_s5 = inlined_call_operand.vmem [shape: f32[1,64], index: 5, kind: input, shape index: {}]   ;;  %s1285_s6 = inlined_call_operand.<no memory space> [shape: f32[1,1], index: 6, kind: input, shape index: {}]   ;;  %s1286_s7 = inlined_call_operand.vmem [shape: f32[1,256], index: 7, kind: output, shape index: {}]  }
   0x1   :  { %12 = sst [smem:[#allocation2]] %s1285_s6 }
   0x2 LB: > { %s1175_s27 = sadd.s32 4294967295, %s1121_s26   ;;  %p870_p0 = scmp.ge.s32.totalorder %s1121_s26, 1  ;;  %s1121_s26 = sphi %s1169_s26, %s18_s26  }
   0x3   : > { %p239_p1 = scmp.lt.s32.totalorder %s1121_s26, 3 }
   0x5   : > { %p240_p2 = pnand %p870_p0, %p239_p1 }
   0x6   : > { %v1093_v0 = vld [vmem:[%s1280_s1] sm:$0xff] (!%p240_p2)   ;;  %s871_s6 = sshll.u32 (!%p240_p2), %s1175_s27, 4  ;;  %v1094_v1 = vld [vmem:[%s1280_s1 + $0x8] sm:$0xff] (!%p240_p2)   ;;  %vm358_vm0 = vcmask (!%p240_p2), 261120   ;;  %v1105_v7 = vld [vmem:[%s1282_s3 + $0x10] sm:$0xff] (!%p240_p2)   ;;  %vm1124_vm1 = vmmov (!%p240_p2), 0  }
   0x7   : > { %243 = sbr.rel (%p240_p2) target bundleno = 768 (0x300), region = 48  ;;  %p270_p3 = scmp.lt.s32.totalorder (!%p240_p2), %s871_s6, 31  ;;  %963 = vmatprep.subr.bf16.mxu1 (!%p240_p2), %v1093_v0  ;;  %v1103_v2 = vld [vmem:[%s1282_s3] sm:$0xff] (!%p240_p2)   ;;  %v1104_v3 = vld [vmem:[%s1282_s3 + $0x8] sm:$0xff] (!%p240_p2)   ;;  %v1106_v9 = vld [vmem:[%s1282_s3 + $0x18] sm:$0xff] (!%p240_p2)   ;;  %vm691_vm2 = vcmask (!%p240_p2), 523264  }
   0x8   : > { %964 = vmatpush3.bf16.msra.mxu1 (!%p240_p2), %v1093_v0  ;;  %v1107_v11 = vld [vmem:[%s1282_s3 + $0x20] sm:$0xff] (!%p240_p2)   ;;  %v1108_v14 = vld [vmem:[%s1282_s3 + $0x28] sm:$0xff] (!%p240_p2)   ;;  %v1109_v16 = vld [vmem:[%s1282_s3 + $0x30] sm:$0xff] (!%p240_p2)   ;;  %s689_s13 = sld [smem:[#allocation2]] (!%p240_p2)  ;;  %p275_p4 = scmp.lt.s32.totalorder (!%p240_p2), %s1175_s27, 1 }
   0x9   : > { %965 = vmatprep.subr.bf16.mxu1 (!%p240_p2), %v1094_v1  ;;  %v1110_v17 = vld [vmem:[%s1282_s3 + $0x38] sm:$0xff] (!%p240_p2)   ;;  %v873_v18 = vld [vmem:[%s1281_s2] ss:$0 sm:$0xff] (!%p240_p2)  ;;  %vm1240_vm3 = vmpackc.low (!%p240_p2), %vm691_vm2, %vm691_vm2 }
   0xc   : > { %966 = vmatpush3.bf16.msra.mxu1 (!%p240_p2), %v1094_v1 }
   0xd   : > { %983 = vmatprep.subr.bf16.mxu1 (!%p240_p2), %v1103_v2 }
   0xe   : > { %s1290_s6 = smov (!%p270_p3, %s871_s6), 31  ;;  %s1292_s27 = smov (!%p275_p4, %s1175_s27), 1 }
   0xf   : > { %s872_s11 = sshll.u32 %s1290_s6, 2  ;;  %s277_s16 = scalar_lea.vmem %s1286_s7, %s1292_s27 }
  0x10   : > { %s1192_s14 = scalar_lea.vmem %s1279_s0, %s872_s11 }
  0x11   : > { %v1095_v4 = vld [vmem:[%s1192_s14] sm:$0xff]   ;;  %v1096_v5 = vld [vmem:[%s1192_s14 + $0x8] sm:$0xff]   ;;  %v1097_v6 = vld [vmem:[%s1192_s14 + $0x10] sm:$0xff]  }
  0x12   : > { %967 = vmatprep.mubr.msk.bf16.mxu1 %vm358_vm0, %v1095_v4  ;;  %v1098_v8 = vld [vmem:[%s1192_s14 + $0x18] sm:$0xff]   ;;  %v1099_v10 = vld [vmem:[%s1192_s14 + $0x20] sm:$0xff]   ;;  %v1100_v12 = vld [vmem:[%s1192_s14 + $0x28] sm:$0xff]  }
  0x13   : > { %968 = vmatmul.mubr.msk.bf16.vlgmr.msra.gmra.mrb[0].mxu1 %vm358_vm0, %v1096_v5  ;;  %v1101_v13 = vld [vmem:[%s1192_s14 + $0x30] sm:$0xff]   ;;  %v1102_v15 = vld [vmem:[%s1192_s14 + $0x38] sm:$0xff]  }
  0x14   : > { %971 = vmatprep.mubr.msk.bf16.mxu1 %vm358_vm0, %v1097_v6  ;;  %984 = vmatpush3.bf16.msra.mxu1 %v1103_v2 }
  0x15   : > { %985 = vmatprep.subr.bf16.mxu1 %v1104_v3 }
  0x18   : > { %986 = vmatpush3.bf16.msra.mxu1 %v1104_v3 }
  0x19   : > { %987 = vmatprep.subr.bf16.mxu1 %v1105_v7 }
  0x1b   : > { %972 = vmatmul.mubr.msk.bf16.gmra.mrb[4].mxu1 %vm358_vm0, %v1098_v8 }
  0x1c   : > { %975 = vmatprep.mubr.msk.bf16.mxu1 %vm358_vm0, %v1099_v10  ;;  %988 = vmatpush3.bf16.msra.mxu1 %v1105_v7 }
  0x1d   : > { %989 = vmatprep.subr.bf16.mxu1 %v1106_v9 }
  0x20   : > { %990 = vmatpush3.bf16.msra.mxu1 %v1106_v9 }
  0x21   : > { %991 = vmatprep.subr.bf16.mxu1 %v1107_v11 }
  0x23   : > { %976 = vmatmul.mubr.msk.bf16.gmra.mrb[8].mxu1 %vm358_vm0, %v1100_v12  ;;  %v1125_v12 = vmov 0.0  }
  0x24   : > { %979 = vmatprep.mubr.msk.bf16.mxu1 %vm358_vm0, %v1101_v13  ;;  %992 = vmatpush3.bf16.msra.mxu1 %v1107_v11  ;;  %v1123_v11 = vmov 0.0|0.0   ;;  %v892_v13 = vld [vmem:[%s1283_s4] ss:$0 sm:$0xff] }
  0x25   : > { %993 = vmatprep.subr.bf16.mxu1 %v1108_v14  ;;  %1050 = vmatprep.subr.bf16.mxu0 %v1123_v11 }
  0x26   : > { %1047 = vmatprep.mubr.msk.f32.mxu0 %vm1124_vm1, %v1125_v12 }
  0x28   : > { %994 = vmatpush3.bf16.msra.mxu1 %v1108_v14 }
  0x29   : > { %995 = vmatprep.subr.bf16.mxu1 %v1109_v16 }
  0x2b   : > { %980 = vmatmul.mubr.msk.bf16.gmra.mrb[12].mxu1 %vm358_vm0, %v1102_v15 }
  0x2c   : > { %996 = vmatpush3.bf16.msra.mxu1 %v1109_v16 }
  0x2d   : > { %997 = vmatprep.subr.bf16.mxu1 %v1110_v17 }
  0x30   : > { %998 = vmatpush3.bf16.msra.mxu1 %v1110_v17 }
  0xe6   : > { %v969_v19 = vpop.f32.mrb[0].mxu1 }
  0xe7   : > { %v426_v20 = vadd.f32 %v969_v19, %v873_v18  ;;  %v417_v21 = vpop.f32.mrb[1].mxu1 }
  0xe8   : > { %v418_v22 = vadd.f32 %v873_v18, %v417_v21  ;;  %v970_v23 = vpop.f32.mrb[2].mxu1 }
  0xe9   : > { %v429_v24 = vadd.f32 %v970_v23, %v873_v18  ;;  %v420_v25 = vpop.f32.mrb[3].mxu1  ;;  %v482_v27 = vmax.f32 %v426_v20, 0.0 }
  0xea   : > { %v421_v26 = vadd.f32 %v873_v18, %v420_v25  ;;  %v480_v29 = vmax.f32 %v418_v22, 0.0 }
  0xeb   : > { %v483_v28 = vmax.f32 %v429_v24, 0.0 }
  0xec   : > { %v481_v30 = vmax.f32 %v421_v26, 0.0 }
  0xed   : > { %v497_v31 = vpack.c.bf16 %v483_v28, %v482_v27 }
  0xee   : > { %v496_v32 = vpack.c.bf16 %v481_v30, %v480_v29  ;;  %v973_v33 = vpop.f32.mrb[4].mxu1 }
  0xef   : > { %v442_v34 = vadd.f32 %v973_v33, %v873_v18  ;;  %v433_v35 = vpop.f32.mrb[5].mxu1 }
  0xf0   : > { %v434_v36 = vadd.f32 %v873_v18, %v433_v35  ;;  %999 = vmatprep.mubr.bf16.mxu1 %v496_v32  ;;  %v974_v37 = vpop.f32.mrb[6].mxu1 }
  0xf1   : > { %v486_v38 = vmax.f32 %v442_v34, 0.0  ;;  %v445_v39 = vadd.f32 %v974_v37, %v873_v18  ;;  %1000 = vmatmul.mubr.bf16.vlgmr.msra.gmra.mrb[16].mxu1 %v497_v31  ;;  %v436_v40 = vpop.f32.mrb[7].mxu1 }
  0xf2   : > { %v484_v41 = vmax.f32 %v434_v36, 0.0  ;;  %v437_v42 = vadd.f32 %v873_v18, %v436_v40 }
  0xf3   : > { %v487_v43 = vmax.f32 %v445_v39, 0.0 }
  0xf4   : > { %v485_v44 = vmax.f32 %v437_v42, 0.0 }
  0xf5   : > { %v499_v45 = vpack.c.bf16 %v487_v43, %v486_v38 }
  0xf6   : > { %v498_v46 = vpack.c.bf16 %v485_v44, %v484_v41  ;;  %v977_v47 = vpop.f32.mrb[8].mxu1 }
  0xf7   : > { %v458_v48 = vadd.f32 %v977_v47, %v873_v18  ;;  %v449_v49 = vpop.f32.mrb[9].mxu1 }
  0xf8   : > { %1003 = vmatprep.mubr.bf16.mxu1 %v498_v46  ;;  %v450_v50 = vadd.f32 %v873_v18, %v449_v49  ;;  %v978_v51 = vpop.f32.mrb[10].mxu1 }
  0xf9   : > { %1004 = vmatmul.mubr.bf16.gmra.mrb[20].mxu1 %v499_v45  ;;  %v490_v52 = vmax.f32 %v458_v48, 0.0  ;;  %v461_v53 = vadd.f32 %v978_v51, %v873_v18  ;;  %v452_v54 = vpop.f32.mrb[11].mxu1 }
  0xfa   : > { %v488_v55 = vmax.f32 %v450_v50, 0.0  ;;  %v453_v56 = vadd.f32 %v873_v18, %v452_v54 }
  0xfb   : > { %v491_v57 = vmax.f32 %v461_v53, 0.0 }
  0xfc   : > { %v489_v58 = vmax.f32 %v453_v56, 0.0 }
  0xfd   : > { %v501_v59 = vpack.c.bf16 %v491_v57, %v490_v52 }
  0xfe   : > { %v500_v60 = vpack.c.bf16 %v489_v58, %v488_v55  ;;  %v981_v61 = vpop.f32.mrb[12].mxu1 }
  0xff   : > { %v474_v62 = vadd.f32 %v981_v61, %v873_v18  ;;  %v465_v63 = vpop.f32.mrb[13].mxu1 }
 0x100   : > { %1007 = vmatprep.mubr.bf16.mxu1 %v500_v60  ;;  %v466_v0 = vadd.f32 %v873_v18, %v465_v63  ;;  %v982_v1 = vpop.f32.mrb[14].mxu1 }
 0x101   : > { %1008 = vmatmul.mubr.bf16.gmra.mrb[24].mxu1 %v501_v59  ;;  %v494_v2 = vmax.f32 %v474_v62, 0.0  ;;  %v477_v3 = vadd.f32 %v982_v1, %v873_v18  ;;  %v468_v4 = vpop.f32.mrb[15].mxu1 }
 0x102   : > { %v492_v5 = vmax.f32 %v466_v0, 0.0  ;;  %v469_v6 = vadd.f32 %v873_v18, %v468_v4 }
 0x103   : > { %v495_v7 = vmax.f32 %v477_v3, 0.0 }
 0x104   : > { %v493_v8 = vmax.f32 %v469_v6, 0.0 }
 0x105   : > { %v503_v9 = vpack.c.bf16 %v495_v7, %v494_v2  ;;  %v688_v7 = vld [vmem:[%s1284_s5] sm:$0x1] }
 0x106   : > { %v502_v10 = vpack.c.bf16 %v493_v8, %v492_v5  ;;  %v690_v8 = vstv %s689_s13 }
 0x108   : > { %1011 = vmatprep.mubr.bf16.mxu1 %v502_v10 }
 0x109   : > { %1012 = vmatmul.mubr.bf16.gmra.mrb[28].mxu1 %v503_v9 }
 0x1c4   : > { %v1001_v14 = vpop.f32.mrb[16].mxu1 }
 0x1c5   : > { %v618_v15 = vadd.f32 %v1001_v14, %v892_v13  ;;  %v609_v16 = vpop.f32.mrb[17].mxu1 }
 0x1c6   : > { %v610_v17 = vadd.f32 %v892_v13, %v609_v16  ;;  %v1002_v18 = vpop.f32.mrb[18].mxu1 }
 0x1c7   : > { %v621_v19 = vadd.f32 %v1002_v18, %v892_v13  ;;  %v612_v20 = vpop.f32.mrb[19].mxu1  ;;  %v674_v22 = vmax.f32 %v618_v15, 0.0 }
 0x1c8   : > { %v613_v21 = vadd.f32 %v892_v13, %v612_v20  ;;  %v672_v24 = vmax.f32 %v610_v17, 0.0 }
 0x1c9   : > { %v675_v23 = vmax.f32 %v621_v19, 0.0 }
 0x1ca   : > { %v673_v25 = vmax.f32 %v613_v21, 0.0 }
 0x1cb   : > { %v1055_v26 = vpack.c.bf16 %v675_v23, %v674_v22 }
 0x1cc   : > { %v1051_v28 = vpack.c.bf16 %v673_v25, %v672_v24  ;;  %v1005_v29 = vpop.f32.mrb[20].mxu1 }
 0x1cd   : > { %v634_v30 = vadd.f32 %v1005_v29, %v892_v13  ;;  %v625_v31 = vpop.f32.mrb[21].mxu1 }
 0x1ce   : > { %v626_v32 = vadd.f32 %v892_v13, %v625_v31  ;;  %1053 = vmatpush3.bf16.xpose.msk.msra.mxu0 %vm1240_vm3, %v1051_v28  ;;  %v1006_v33 = vpop.f32.mrb[22].mxu1 }
 0x1cf   : > { %v678_v34 = vmax.f32 %v634_v30, 0.0  ;;  %v637_v35 = vadd.f32 %v1006_v33, %v892_v13  ;;  %v628_v36 = vpop.f32.mrb[23].mxu1  ;;  %1054 = vmatprep.subr.bf16.mxu0 %v1123_v11 }
 0x1d0   : > { %v676_v37 = vmax.f32 %v626_v32, 0.0  ;;  %v629_v38 = vadd.f32 %v892_v13, %v628_v36 }
 0x1d1   : > { %v679_v39 = vmax.f32 %v637_v35, 0.0 }
 0x1d2   : > { %v677_v40 = vmax.f32 %v629_v38, 0.0 }
 0x1d3   : > { %v1063_v41 = vpack.c.bf16 %v679_v39, %v678_v34 }
 0x1d4   : > { %v1059_v42 = vpack.c.bf16 %v677_v40, %v676_v37  ;;  %v1009_v43 = vpop.f32.mrb[24].mxu1 }
 0x1d5   : > { %v650_v44 = vadd.f32 %v1009_v43, %v892_v13  ;;  %v641_v45 = vpop.f32.mrb[25].mxu1 }
 0x1d6   : > { %1057 = vmatpush3.bf16.xpose.msk.msra.mxu0 %vm1240_vm3, %v1055_v26  ;;  %v642_v46 = vadd.f32 %v892_v13, %v641_v45  ;;  %v1010_v47 = vpop.f32.mrb[26].mxu1 }
 0x1d7   : > { %v682_v48 = vmax.f32 %v650_v44, 0.0  ;;  %1058 = vmatprep.subr.bf16.mxu0 %v1123_v11  ;;  %v653_v49 = vadd.f32 %v1010_v47, %v892_v13  ;;  %v644_v50 = vpop.f32.mrb[27].mxu1 }
 0x1d8   : > { %v680_v51 = vmax.f32 %v642_v46, 0.0  ;;  %v645_v52 = vadd.f32 %v892_v13, %v644_v50 }
 0x1d9   : > { %v683_v53 = vmax.f32 %v653_v49, 0.0 }
 0x1da   : > { %v681_v54 = vmax.f32 %v645_v52, 0.0 }
 0x1db   : > { %v1071_v55 = vpack.c.bf16 %v683_v53, %v682_v48 }
 0x1dc   : > { %v1067_v56 = vpack.c.bf16 %v681_v54, %v680_v51  ;;  %v1013_v57 = vpop.f32.mrb[28].mxu1 }
 0x1dd   : > { %v666_v58 = vadd.f32 %v1013_v57, %v892_v13  ;;  %v657_v59 = vpop.f32.mrb[29].mxu1 }
 0x1de   : > { %1061 = vmatpush3.bf16.xpose.msk.msra.mxu0 %vm1240_vm3, %v1059_v42  ;;  %v658_v60 = vadd.f32 %v892_v13, %v657_v59  ;;  %v1014_v61 = vpop.f32.mrb[30].mxu1 }
 0x1df   : > { %1062 = vmatprep.subr.bf16.mxu0 %v1123_v11  ;;  %v686_v62 = vmax.f32 %v666_v58, 0.0  ;;  %v669_v63 = vadd.f32 %v1014_v61, %v892_v13  ;;  %v660_v0 = vpop.f32.mrb[31].mxu1 }
 0x1e0   : > { %v684_v1 = vmax.f32 %v658_v60, 0.0  ;;  %v661_v2 = vadd.f32 %v892_v13, %v660_v0 }
 0x1e1   : > { %v687_v3 = vmax.f32 %v669_v63, 0.0 }
 0x1e2   : > { %v685_v4 = vmax.f32 %v661_v2, 0.0 }
 0x1e3   : > { %v1079_v5 = vpack.c.bf16 %v687_v3, %v686_v62 }
 0x1e4   : > { %v1075_v6 = vpack.c.bf16 %v685_v4, %v684_v1 }
 0x1e6   : > { %1065 = vmatpush3.bf16.xpose.msk.msra.mxu0 %vm1240_vm3, %v1063_v41 }
 0x1e7   : > { %1066 = vmatprep.subr.bf16.mxu0 %v1123_v11 }
 0x1ee   : > { %1069 = vmatpush3.bf16.xpose.msk.msra.mxu0 %vm1240_vm3, %v1067_v56 }
 0x1ef   : > { %1070 = vmatprep.subr.bf16.mxu0 %v1123_v11 }
 0x1f6   : > { %1073 = vmatpush3.bf16.xpose.msk.msra.mxu0 %vm1240_vm3, %v1071_v55 }
 0x1f7   : > { %1074 = vmatprep.subr.bf16.mxu0 %v1123_v11 }
 0x1fe   : > { %1077 = vmatpush3.bf16.xpose.msk.msra.mxu0 %vm1240_vm3, %v1075_v6 }
 0x1ff   : > { %1078 = vmatprep.subr.bf16.mxu0 %v1123_v11 }
 0x206   : > { %1081 = vmatpush3.bf16.xpose.msk.msra.mxu0 %vm1240_vm3, %v1079_v5 }
 0x20d   : > { %1048 = vmatmul.mubr.msk.f32.vlgmr.msra.gmra.mrb[0].mxu0 %vm691_vm2, %v688_v7 }
 0x2e0   : > { %v809_v9 = vpop.f32.mrb[0].mxu0 }
 0x2e1   : > { %v810_v10 = vadd.f32 %v809_v9, %v690_v8  ;;  %v1049_v12 = vpop.f32.mrb[1].mxu0 }
 0x2e3   : > { %v813_v13 = vsub.f32 0.0, %v810_v10 }
 0x2e5   : > { %v814_v14 = vmul.f32 1.442695, %v813_v13 }
 0x2e7   : > { %1111 = vpow2.f32 %v814_v14 }
 0x2f1   : > { %v1112_v15 = vpop.eup %1111 }
 0x2f2   : > { %v816_v11 = vadd.f32 1.0, %v1112_v15 }
 0x2f4   : > { %1113 = vrcp.f32 %v816_v11 }
 0x2fe   : > { %v1114_v16 = vpop.eup %1113 }
 0x2ff   : > { %818 = vst [vmem:[%s277_s16] sm:$0x1] %v1114_v16 }
 0x300 PF: > { %s18_s26 = sadd.s32 1, %s1121_s26  }
 0x301   : > { %p15_p5 = scmp.ge.s32.totalorder %s18_s26, 4  }
 0x303   :  { %17 = sbr.rel (!%p15_p5) target bundleno = 2 (0x2), region = 78 }

</bundles_post_ra>
